<compile_context>
chip_gen: v7x
topology: tpu7x:2x2x1
jax: 0.10.0
libtpu: 0.0.40
codegen_flags: <defaults>
</compile_context>

<pallas_src>
from functools import partial
from typing import NamedTuple, Optional

import jax
import jax.numpy as jnp
from jax.experimental import pallas as pl
from jax.experimental.pallas import tpu as pltpu


# ---------------------------------------------------------------------------
# Kernel
# ---------------------------------------------------------------------------

def _make_kernel(needs_cast: bool):
    """Build the LS kernel body.

    Refs (one (batch-tile i, out-tile j) block, reduced over the k grid axis):
      x_ref : (tb, tk)        activation tile
      x1_ref: (tb, rank_p)    precomputed x @ W^T (rank zero-padded to 128)
      ut_ref: (rank_p, tn)    U^T tile
      st_ref: (tk, tn)        S^T tile (dense "sparse" path)
      o_ref : (tb, tn)        output tile (f32 -> also the accumulator)
      acc   : (tb, tn) f32    scratch accumulator, only when needs_cast
    """

    def kernel(x_ref, x1_ref, ut_ref, st_ref, o_ref, *scratch):
        acc_ref = scratch[0] if needs_cast else o_ref
        k = pl.program_id(2)

        @pl.when(k == 0)
        def _init():
            # Low-rank up-projection seeds the accumulator once per (i, j).
            acc_ref[...] = jnp.dot(x1_ref[...], ut_ref[...],
                                   preferred_element_type=jnp.float32)

        # Dense path, reduced over the in-feature grid axis.
        acc_ref[...] += jnp.dot(x_ref[...], st_ref[...],
                                preferred_element_type=jnp.float32)

        if needs_cast:
            @pl.when(k == pl.num_programs(2) - 1)
            def _finalize():
                o_ref[...] = acc_ref[...].astype(o_ref.dtype)

    return kernel


# ---------------------------------------------------------------------------
# Tiling helpers
# ---------------------------------------------------------------------------

def _round_up(x, m):
    return (x + m - 1) // m * m


def _cdiv(a, b):
    return -(-a // b)


def _choose_tile(dim, granule, max_tile):
    """Largest tile (multiple of `granule`, <= max_tile-ish) minimizing tile count,
    then padding of `dim` up to a multiple of the tile."""
    d = _round_up(dim, granule)
    if d <= max_tile:
        return d
    n_tiles = _cdiv(d, max_tile)
    return _round_up(_cdiv(d, n_tiles), granule)


def _sublane_mult(dtype):
    # Sublane packing granularity: 8 rows (f32), 16 (bf16), 32 (8-bit types).
    return max(8, 32 // jnp.dtype(dtype).itemsize)


class _LSMeta(NamedTuple):
    in_f: int
    out_f: int
    in_p: int
    out_fp: int
    tk: int
    tn: int
    rank_p: int


# ---------------------------------------------------------------------------
# Weight preparation (call ONCE at init) and forward apply
# ---------------------------------------------------------------------------

def prepare_ls_weights(W, U, S, *, compute_dtype: Optional[jnp.dtype] = None,
                       tk_max: int = 1024, tn_max: int = 512):
    """Pre-transpose / pad / cast the LSModule weights once.

    Returns (Wtp, Utp, Stp, meta) to be reused across forwards via
    ls_module_apply(); doing this per call would re-stream S through HBM.
    """
    rank, in_f = W.shape
    out_f, rank_u = U.shape
    assert rank_u == rank and S.shape == (out_f, in_f)

    tk = int(_choose_tile(in_f, 128, tk_max))
    tn = int(_choose_tile(out_f, 128, tn_max))
    in_p = int(_round_up(in_f, tk))
    out_fp = int(_round_up(out_f, tn))
    rank_p = int(_round_up(rank, 128))

    Wt, Ut, St = W.T, U.T, S.T                      # (in, r), (r, out), (in, out)
    if compute_dtype is not None:
        Wt = Wt.astype(compute_dtype)
        Ut = Ut.astype(compute_dtype)
        St = St.astype(compute_dtype)

    # Zero padding does not change the math (padded rows/cols contribute 0).
    Wtp = jnp.pad(Wt, ((0, in_p - in_f), (0, rank_p - rank)))
    Utp = jnp.pad(Ut, ((0, rank_p - rank), (0, out_fp - out_f)))
    Stp = jnp.pad(St, ((0, in_p - in_f), (0, out_fp - out_f)))

    meta = _LSMeta(int(in_f), int(out_f), in_p, out_fp, tk, tn, rank_p)
    return Wtp, Utp, Stp, meta


@partial(jax.jit, static_argnums=(4,))
def _ls_apply(x, Wtp, Utp, Stp, meta: _LSMeta):
    B, in_f = x.shape
    assert in_f == meta.in_f
    out_dtype = x.dtype
    cdt = Stp.dtype                                  # compute dtype = weight dtype

    # Batch tile: as large as possible (fill the MXU M dim, amortize per-step
    # overhead), rounded to the sublane packing of every dtype used in blocks.
    sub = max(_sublane_mult(cdt), _sublane_mult(out_dtype))
    tb = int(_choose_tile(B, sub, 512))
    b_p = int(_round_up(B, tb))

    xp = jnp.pad(x.astype(cdt), ((0, b_p - B), (0, meta.in_p - in_f)))

    # Low-rank down-projection outside the kernel: a tiny GEMM done once per
    # forward (rank padded to 128 lanes), instead of once per out-feature tile.
    x1 = jnp.dot(xp, Wtp).astype(cdt)                # (b_p, rank_p)

    needs_cast = out_dtype != jnp.float32
    kernel = _make_kernel(needs_cast)

    tk, tn = meta.tk, meta.tn
    grid = (b_p // tb, meta.out_fp // tn, meta.in_p // tk)   # (batch, out, in-red)

    in_specs = [
        pl.BlockSpec((tb, tk), lambda i, j, k: (i, k)),            # x
        pl.BlockSpec((tb, meta.rank_p), lambda i, j, k: (i, 0)),   # x @ W^T
        pl.BlockSpec((meta.rank_p, tn), lambda i, j, k: (0, j)),   # U^T
        pl.BlockSpec((tk, tn), lambda i, j, k: (k, j)),            # S^T
    ]
    out_specs = pl.BlockSpec((tb, tn), lambda i, j, k: (i, j))
    scratch = [pltpu.VMEM((tb, tn), jnp.float32)] if needs_cast else []

    # Working-set sanity: double-buffered inputs + output + scratch stays far
    # below the 48 MiB limit (and v7x's 64 MiB/TC) for tb<=512, tk<=1024, tn<=512.
    itm = jnp.dtype(cdt).itemsize
    ws = (2 * (tb * tk + tb * meta.rank_p + meta.rank_p * tn + tk * tn) * itm
          + 2 * tb * tn * jnp.dtype(out_dtype).itemsize
          + (tb * tn * 4 if needs_cast else 0))
    assert ws <= 40 * 1024 * 1024, f"unexpected VMEM working set {ws} bytes"

    y_pad = pl.pallas_call(
        kernel,
        out_shape=jax.ShapeDtypeStruct((b_p, meta.out_fp), out_dtype),
        grid_spec=pltpu.PrefetchScalarGridSpec(
            num_scalar_prefetch=0,
            grid=grid,
            in_specs=in_specs,
            out_specs=out_specs,
            scratch_shapes=scratch,
        ),
        compiler_params=pltpu.CompilerParams(
            dimension_semantics=("parallel", "parallel", "arbitrary"),
            vmem_limit_bytes=48 * 1024 * 1024,
        ),
    )(xp, x1, Utp, Stp)

    return y_pad[:B, :meta.out_f]


def ls_module_apply(x, prepared):
    """Forward with weights already prepared by prepare_ls_weights()."""
    Wtp, Utp, Stp, meta = prepared
    return _ls_apply(x, Wtp, Utp, Stp, meta)


def ls_module_forward(x, W, U, S, *, compute_dtype=None, tk_max=1024, tn_max=512):
    """One-shot convenience wrapper (prepare + apply).

    For repeated forwards call prepare_ls_weights() once and reuse the result
    with ls_module_apply() — that hoists the transpose/pad/cast HBM round-trips
    of S/U/W out of the per-call path.
    """
    prepared = prepare_ls_weights(W, U, S, compute_dtype=compute_dtype,
                                  tk_max=tk_max, tn_max=tn_max)
    return ls_module_apply(x, prepared)


# ---------------------------------------------------------------------------
# Demo / correctness check
# ---------------------------------------------------------------------------

def _torch_linear_init(key, out_f, in_f):
    # Mimic nn.Linear default init: U(-1/sqrt(fan_in), 1/sqrt(fan_in)).
    bound = 1.0 / jnp.sqrt(jnp.float32(in_f))
    return jax.random.uniform(key, (out_f, in_f), jnp.float32, -bound, bound)


def _run_case(key, *, batch, in_f, out_f, rank, compute_dtype=None,
              x_dtype=jnp.float32, tk_max=1024, tn_max=512,
              atol=2e-5, rtol=2e-5):
    kx, kw, ku, ks = jax.random.split(key, 4)
    x = jax.random.normal(kx, (batch, in_f), jnp.float32)
    W = _torch_linear_init(kw, rank, in_f)            # W_layer.weight
    U = _torch_linear_init(ku, out_f, rank)           # U_layer.weight
    S = _torch_linear_init(ks, out_f, in_f)           # S_layer.weight

    x_in = x.astype(x_dtype)
    prepared = prepare_ls_weights(W, U, S, compute_dtype=compute_dtype,
                                  tk_max=tk_max, tn_max=tn_max)
    out = jax.block_until_ready(ls_module_apply(x_in, prepared))
    assert out.shape == (batch, out_f)
    assert out.dtype == x_in.dtype

    # Reference (module math) in f32, on the operands as the kernel saw them.
    cd = compute_dtype if compute_dtype is not None else jnp.float32
    xr = x_in.astype(cd).astype(jnp.float32)
    Wr = W.astype(cd).astype(jnp.float32)
    Ur = U.astype(cd).astype(jnp.float32)
    Sr = S.astype(cd).astype(jnp.float32)
    ref = (xr @ Wr.T) @ Ur.T + xr @ Sr.T

    out_f32 = out.astype(jnp.float32)
    max_err = jnp.max(jnp.abs(out_f32 - ref))
    assert jnp.allclose(out_f32, ref, atol=atol, rtol=rtol), \
        f"mismatch, max abs err={max_err}"


if __name__ == "__main__":
    key = jax.random.PRNGKey(0)
    keys = jax.random.split(key, 5)

    # 1) Small shapes implied by the module (linear, sparse_matrix=True), f32.
    _run_case(keys[0], batch=16, in_f=32, out_f=16, rank=8)

    # 2) Awkward (non-128-multiple) sizes: single fat k tile (tk=384), f32.
    _run_case(keys[1], batch=24, in_f=272, out_f=40, rank=8)

    # 3) Multi-tile out + in-feature reduction axes (3x3 weight tiles), f32.
    _run_case(keys[2], batch=40, in_f=384, out_f=320, rank=16,
              tk_max=128, tn_max=128, atol=1e-4, rtol=1e-4)

    # 4) bf16 compute + bf16 output: exercises the 16-row sublane batch tiling
    #    and the f32-scratch + cast epilogue path.
    _run_case(keys[3], batch=24, in_f=272, out_f=40, rank=8,
              compute_dtype=jnp.bfloat16, x_dtype=jnp.bfloat16,
              atol=5e-2, rtol=5e-2)

    # 5) bf16 compute with f32 activations/outputs (direct o_ref accumulation).
    _run_case(keys[4], batch=32, in_f=256, out_f=128, rank=8,
              compute_dtype=jnp.bfloat16, atol=5e-2, rtol=5e-2)

    print("KERNEL_OK")
</pallas_src>

<mosaic_0001>
module attributes {stable_mosaic.version = 11 : i64} {
  func.func @kernel(%arg0: i32, %arg1: i32, %arg2: i32, %arg3: memref<16x128xf32, #tpu.memory_space<vmem>>, %arg4: memref<16x128xf32, #tpu.memory_space<vmem>>, %arg5: memref<128x128xf32, #tpu.memory_space<vmem>>, %arg6: memref<128x128xf32, #tpu.memory_space<vmem>>, %arg7: memref<16x128xf32, #tpu.memory_space<vmem>>) attributes {dimension_semantics = [#tpu.dimension_semantics<parallel>, #tpu.dimension_semantics<parallel>, #tpu.dimension_semantics<arbitrary>], iteration_bounds = array<i64: 1, 1, 1>, scalar_prefetch = 0 : i64, scratch_operands = 0 : i64, tpu.core_type = #tpu.core_type<tc>, window_params = [{transform_indices = @transform_0, window_bounds = array<i64: 16, 128>}, {transform_indices = @transform_1, window_bounds = array<i64: 16, 128>}, {transform_indices = @transform_2, window_bounds = array<i64: 128, 128>}, {transform_indices = @transform_3, window_bounds = array<i64: 128, 128>}, {transform_indices = @transform_4, window_bounds = array<i64: 16, 128>}]} {
    %c0_i32 = arith.constant 0 : i32
    %0 = arith.cmpi eq, %arg2, %c0_i32 : i32
    %1 = arith.extui %0 : i1 to i32
    %c0_i32_0 = arith.constant 0 : i32
    %2 = arith.cmpi ne, %1, %c0_i32_0 : i32
    scf.if %2 {
      %c0_8 = arith.constant 0 : index
      %c0_9 = arith.constant 0 : index
      %9 = vector.load %arg4[%c0_8, %c0_9] : memref<16x128xf32, #tpu.memory_space<vmem>>, vector<16x128xf32>
      %c0_10 = arith.constant 0 : index
      %c0_11 = arith.constant 0 : index
      %10 = vector.load %arg5[%c0_10, %c0_11] : memref<128x128xf32, #tpu.memory_space<vmem>>, vector<128x128xf32>
      %cst_12 = arith.constant dense<0.000000e+00> : vector<16x128xf32>
      %11 = tpu.matmul %9, %10, %cst_12 {dimension_numbers = #tpu.dot_dimension_numbers<[1], [0], [0], [1], [0, 0, 1, 1], [], []>} : vector<16x128xf32>, vector<128x128xf32>, vector<16x128xf32> -> vector<16x128xf32>
      %c0_13 = arith.constant 0 : index
      %c0_14 = arith.constant 0 : index
      %12 = vector.load %arg7[%c0_13, %c0_14] : memref<16x128xf32, #tpu.memory_space<vmem>>, vector<16x128xf32>
      tpu.vector_store %arg7[%c0_13, %c0_14], %11 {strides = array<i32>} : memref<16x128xf32, #tpu.memory_space<vmem>>, vector<16x128xf32>,
    } else {
    }
    %c0 = arith.constant 0 : index
    %c0_1 = arith.constant 0 : index
    %3 = vector.load %arg7[%c0, %c0_1] : memref<16x128xf32, #tpu.memory_space<vmem>>, vector<16x128xf32>
    %c0_2 = arith.constant 0 : index
    %c0_3 = arith.constant 0 : index
    %4 = vector.load %arg3[%c0_2, %c0_3] : memref<16x128xf32, #tpu.memory_space<vmem>>, vector<16x128xf32>
    %c0_4 = arith.constant 0 : index
    %c0_5 = arith.constant 0 : index
    %5 = vector.load %arg6[%c0_4, %c0_5] : memref<128x128xf32, #tpu.memory_space<vmem>>, vector<128x128xf32>
    %cst = arith.constant dense<0.000000e+00> : vector<16x128xf32>
    %6 = tpu.matmul %4, %5, %cst {dimension_numbers = #tpu.dot_dimension_numbers<[1], [0], [0], [1], [0, 0, 1, 1], [], []>} : vector<16x128xf32>, vector<128x128xf32>, vector<16x128xf32> -> vector<16x128xf32>
    %7 = arith.addf %3, %6 : vector<16x128xf32>
    %c0_6 = arith.constant 0 : index
    %c0_7 = arith.constant 0 : index
    %8 = vector.load %arg7[%c0_6, %c0_7] : memref<16x128xf32, #tpu.memory_space<vmem>>, vector<16x128xf32>
    tpu.vector_store %arg7[%c0_6, %c0_7], %7 {strides = array<i32>} : memref<16x128xf32, #tpu.memory_space<vmem>>, vector<16x128xf32>,
    return
  }
  func.func @transform_0(%arg0: i32, %arg1: i32, %arg2: i32) -> (i32, i32) {
    %c0_i32 = arith.constant 0 : i32
    return %arg0, %arg2 : i32, i32
  }
  func.func @transform_1(%arg0: i32, %arg1: i32, %arg2: i32) -> (i32, i32) {
    %c0_i32 = arith.constant 0 : i32
    %c0_i32_0 = arith.constant 0 : i32
    return %arg0, %c0_i32 : i32, i32
  }
  func.func @transform_2(%arg0: i32, %arg1: i32, %arg2: i32) -> (i32, i32) {
    %c0_i32 = arith.constant 0 : i32
    %c0_i32_0 = arith.constant 0 : i32
    return %c0_i32, %arg1 : i32, i32
  }
  func.func @transform_3(%arg0: i32, %arg1: i32, %arg2: i32) -> (i32, i32) {
    %c0_i32 = arith.constant 0 : i32
    return %arg2, %arg1 : i32, i32
  }
  func.func @transform_4(%arg0: i32, %arg1: i32, %arg2: i32) -> (i32, i32) {
    %c0_i32 = arith.constant 0 : i32
    return %arg0, %arg1 : i32, i32
  }
}

</mosaic_0001>

<bundles_post_ra>
// kernel: _ls_apply.1
= control target key start
LH: loop header
LB: loop body
LE: loop exit
PB: predicated region body
PF: predicated region fallthrough
CT: control target
= control target key end

     0   :  { %9 = vsyncpa [#allocation3], 0  ;;  %s594_s0 = inlined_call_operand.vmem [shape: f32[16,128], index: 0, kind: input, shape index: {}]   ;;  %s595_s1 = inlined_call_operand.vmem [shape: f32[16,128], index: 1, kind: input, shape index: {}]   ;;  %s596_s2 = inlined_call_operand.vmem [shape: f32[128,128], index: 2, kind: input, shape index: {}]   ;;  %s597_s3 = inlined_call_operand.hbm [shape: f32[128,128], index: 3, kind: input, shape index: {}]   ;;  %s598_s4 = inlined_call_operand.hbm [shape: f32[16,128], index: 4, kind: output, shape index: {}]  }
   0x1   :  { %10 = vsyncpa [#allocation4], 0  ;;  %s475_s15 = smov [#allocation2]   ;;  %s427_s19 = scalar_lea.hbm %s597_s3, 2048 }
   0x2   :  { %s22_s16 = sshll.u32 %s475_s15, 4  ;;  %p428_p0 = scmp.ne.s32.totalorder %s597_s3, %s427_s19  ;;  %s23_s16 = int_to_ptr.vmem [resolvable:$true] %s22_s16 }
   0x3   :  { %p431_p1 = scmp.lt.u32.totalorder %s427_s19, %s597_s3 }
   0x5   :  { %p433_p2 = pnand %p431_p1, %p428_p0 }
   0x7   :  { %436 = shalt.err (!%p433_p2)
}
   0x8   :  { %s437_s24 = scalar_lea.vmem %s23_s16, 2048  ;;  %p442_p4 = scmp.lt.s32.totalorder %s23_s16, %s23_s16 }
   0x9   :  { %p438_p3 = scmp.ne.s32.totalorder %s23_s16, %s437_s24  ;;  %p443_p5 = scmp.lt.s32.totalorder %s437_s24, %s437_s24 }
   0xb   :  { %p444_p6 = por %p443_p5, %p442_p4 }
   0xd   :  { %p445_p7 = pnand %p444_p6, %p438_p3 }
   0xf   :  { %448 = shalt.err (!%p445_p7)
}
  0x10   :  { %s476_s25 = smov 128   ;;  %s477_s26 = smov 8  }
  0x11   :  { %28 = dma.hbm_to_vmem [thread:$0]  %s597_s3, 2048, %s23_s16, [#allocation3], %s476_s25, %s476_s25, %s477_s26  }
  0x12   :  { %471 = dma.done.wait [#allocation3], 2048  }
  0x13   :  { %472 = vsyncadd [#allocation3], 4294965248  ;;  %v38_v0 = vld [vmem:[%s596_s2] sm:$0xff]  ;;  %v39_v1 = vld [vmem:[%s596_s2 + $0x8] sm:$0xff]  ;;  %s478_s16 = smov [#allocation5]  }
  0x14   :  { %v40_v2 = vld [vmem:[%s596_s2 + $0x10] sm:$0xff]  ;;  %v353_v3 = vpack.c.bf16 %v39_v1, %v38_v0  ;;  %v41_v4 = vld [vmem:[%s596_s2 + $0x18] sm:$0xff]  ;;  %v135_v5 = vld [vmem:[#allocation2] sm:$0xff]  ;;  %s235_s17 = sshll.u32 %s478_s16, 4  ;;  %s236_s17 = int_to_ptr.vmem [resolvable:$true] %s235_s17 }
  0x15   :  { %v136_v6 = vld [vmem:[#allocation2 + $0x8] sm:$0xff]  ;;  %v357_v7 = vpack.c.bf16 %v41_v4, %v40_v2  ;;  %v42_v9 = vld [vmem:[%s596_s2 + $0x20] sm:$0xff]  ;;  %v137_v11 = vld [vmem:[#allocation2 + $0x10] sm:$0xff]  ;;  %s449_s18 = scalar_lea.vmem %s236_s17, 256  ;;  %p454_p9 = scmp.lt.s32.totalorder %s236_s17, %s236_s17 }
  0x16   :  { %v385_v8 = vpack.c.bf16 %v136_v6, %v135_v5  ;;  %v43_v10 = vld [vmem:[%s596_s2 + $0x28] sm:$0xff]  ;;  %354 = vmatprep.subr.bf16.mxu1 %v353_v3  ;;  %v138_v12 = vld [vmem:[#allocation2 + $0x18] sm:$0xff]  ;;  %v139_v14 = vld [vmem:[#allocation2 + $0x20] sm:$0xff]  ;;  %p450_p8 = scmp.ne.s32.totalorder %s236_s17, %s449_s18  ;;  %p455_p10 = scmp.lt.s32.totalorder %s449_s18, %s449_s18 }
  0x17   :  { %356 = vmatpush3.bf16.msra.mxu1 %v353_v3  ;;  %v389_v13 = vpack.c.bf16 %v138_v12, %v137_v11  ;;  %v140_v15 = vld [vmem:[#allocation2 + $0x28] sm:$0xff]  ;;  %v361_v16 = vpack.c.bf16 %v43_v10, %v42_v9  ;;  %v44_v17 = vld [vmem:[%s596_s2 + $0x30] sm:$0xff]  ;;  %v45_v18 = vld [vmem:[%s596_s2 + $0x38] sm:$0xff] }
  0x18   :  { %386 = vmatprep.subr.bf16.mxu0 %v385_v8  ;;  %358 = vmatprep.subr.bf16.mxu1 %v357_v7  ;;  %v393_v19 = vpack.c.bf16 %v140_v15, %v139_v14  ;;  %v141_v20 = vld [vmem:[#allocation2 + $0x30] sm:$0xff]  ;;  %v142_v21 = vld [vmem:[#allocation2 + $0x38] sm:$0xff]  ;;  %v365_v22 = vpack.c.bf16 %v45_v18, %v44_v17  ;;  %v36_v23 = vld [vmem:[%s595_s1] sm:$0xff]  ;;  %p456_p11 = por %p455_p10, %p454_p9 }
  0x19   :  { %388 = vmatpush3.bf16.msra.mxu0 %v385_v8  ;;  %v46_v24 = vld [vmem:[%s596_s2 + $0x40] sm:$0xff]  ;;  %v47_v25 = vld [vmem:[%s596_s2 + $0x48] sm:$0xff]  ;;  %v397_v26 = vpack.c.bf16 %v142_v21, %v141_v20  ;;  %315 = vmatprep.mubr.f32.mxu1 %v36_v23  ;;  %v48_v31 = vld [vmem:[%s596_s2 + $0x50] sm:$0xff] }
  0x1a   :  { %390 = vmatprep.subr.bf16.mxu0 %v389_v13  ;;  %v143_v27 = vld [vmem:[#allocation2 + $0x40] sm:$0xff]  ;;  %v144_v28 = vld [vmem:[#allocation2 + $0x48] sm:$0xff]  ;;  %v369_v30 = vpack.c.bf16 %v47_v25, %v46_v24  ;;  %v49_v32 = vld [vmem:[%s596_s2 + $0x58] sm:$0xff]  ;;  %p457_p12 = pnand %p456_p11, %p450_p8 }
  0x1b   :  { %360 = vmatpush3.bf16.msra.mxu1 %v357_v7  ;;  %v133_v29 = vld [vmem:[%s594_s0] sm:$0xff]  ;;  %v401_v33 = vpack.c.bf16 %v144_v28, %v143_v27  ;;  %v145_v34 = vld [vmem:[#allocation2 + $0x50] sm:$0xff]  ;;  %v146_v35 = vld [vmem:[#allocation2 + $0x58] sm:$0xff]  ;;  %v373_v36 = vpack.c.bf16 %v49_v32, %v48_v31 }
  0x1c   :  { %362 = vmatprep.subr.bf16.mxu1 %v361_v16  ;;  %350 = vmatprep.mubr.f32.mxu0 %v133_v29  ;;  %v50_v37 = vld [vmem:[%s596_s2 + $0x60] sm:$0xff]  ;;  %v51_v38 = vld [vmem:[%s596_s2 + $0x68] sm:$0xff]  ;;  %v405_v39 = vpack.c.bf16 %v146_v35, %v145_v34  ;;  %v52_v43 = vld [vmem:[%s596_s2 + $0x70] sm:$0xff] }
  0x1d   :  { %392 = vmatpush3.bf16.msra.mxu0 %v389_v13  ;;  %v147_v40 = vld [vmem:[#allocation2 + $0x60] sm:$0xff]  ;;  %v148_v41 = vld [vmem:[#allocation2 + $0x68] sm:$0xff]  ;;  %v377_v42 = vpack.c.bf16 %v51_v38, %v50_v37  ;;  %v53_v44 = vld [vmem:[%s596_s2 + $0x78] sm:$0xff] }
  0x1e   :  { %394 = vmatprep.subr.bf16.mxu0 %v393_v19  ;;  %v409_v45 = vpack.c.bf16 %v148_v41, %v147_v40  ;;  %v149_v46 = vld [vmem:[#allocation2 + $0x70] sm:$0xff]  ;;  %v150_v47 = vld [vmem:[#allocation2 + $0x78] sm:$0xff]  ;;  %v381_v48 = vpack.c.bf16 %v53_v44, %v52_v43  ;;  %v37_v50 = vld [vmem:[%s595_s1 + $0x8] sm:$0xff] }
  0x1f   :  { %364 = vmatpush3.bf16.msra.mxu1 %v361_v16  ;;  %v413_v49 = vpack.c.bf16 %v150_v47, %v149_v46  ;;  %v134_v51 = vld [vmem:[%s594_s0 + $0x8] sm:$0xff] }
  0x20   :  { %366 = vmatprep.subr.bf16.mxu1 %v365_v22 }
  0x21   :  { %396 = vmatpush3.bf16.msra.mxu0 %v393_v19 }
  0x22   :  { %398 = vmatprep.subr.bf16.mxu0 %v397_v26 }
  0x23   :  { %368 = vmatpush3.bf16.msra.mxu1 %v365_v22 }
  0x24   :  { %370 = vmatprep.subr.bf16.mxu1 %v369_v30 }
  0x25   :  { %400 = vmatpush3.bf16.msra.mxu0 %v397_v26 }
  0x26   :  { %402 = vmatprep.subr.bf16.mxu0 %v401_v33 }
  0x27   :  { %372 = vmatpush3.bf16.msra.mxu1 %v369_v30 }
  0x28   :  { %374 = vmatprep.subr.bf16.mxu1 %v373_v36 }
  0x29   :  { %404 = vmatpush3.bf16.msra.mxu0 %v401_v33 }
  0x2a   :  { %406 = vmatprep.subr.bf16.mxu0 %v405_v39 }
  0x2b   :  { %376 = vmatpush3.bf16.msra.mxu1 %v373_v36 }
  0x2c   :  { %378 = vmatprep.subr.bf16.mxu1 %v377_v42 }
  0x2d   :  { %408 = vmatpush3.bf16.msra.mxu0 %v405_v39 }
  0x2e   :  { %410 = vmatprep.subr.bf16.mxu0 %v409_v45 }
  0x2f   :  { %380 = vmatpush3.bf16.msra.mxu1 %v377_v42 }
  0x30   :  { %382 = vmatprep.subr.bf16.mxu1 %v381_v48 }
  0x31   :  { %412 = vmatpush3.bf16.msra.mxu0 %v409_v45 }
  0x32   :  { %414 = vmatprep.subr.bf16.mxu0 %v413_v49 }
  0x33   :  { %384 = vmatpush3.bf16.msra.mxu1 %v381_v48 }
  0x35   :  { %416 = vmatpush3.bf16.msra.mxu0 %v413_v49 }
  0x36   :  { %316 = vmatmul.mubr.f32.vlgmr.msra.gmra.mrb[0].mxu1 %v37_v50 }
  0x38   :  { %351 = vmatmul.mubr.f32.vlgmr.msra.gmra.mrb[0].mxu0 %v134_v51 }
 0x109   :  { %v317_v52 = vpop.f32.mrb[0].mxu1 }
 0x10a   :  { %v120_v53 = vpop.f32.mrb[1].mxu1 }
 0x10b   :  { %v352_v54 = vpop.f32.mrb[0].mxu0 }
 0x10c   :  { %v419_v55 = vadd.f32 %v352_v54, %v317_v52  ;;  %v217_v56 = vpop.f32.mrb[1].mxu0 }
 0x10d   :  { %v422_v57 = vadd.f32 %v217_v56, %v120_v53 }
 0x10e   :  { %229 = vst [vmem:[#allocation5 + $0x8] sm:$0xff] %v419_v55 }
 0x10f   :  { %228 = vst [vmem:[#allocation5] sm:$0xff] %v422_v57 }
 0x110   :  { %460 = shalt.err (!%p457_p12)
}
 0x111   :  { %s461_s19 = scalar_lea.hbm %s598_s4, 256 }
 0x112   :  { %p462_p13 = scmp.ne.s32.totalorder %s598_s4, %s461_s19  ;;  %p465_p0 = scmp.lt.u32.totalorder %s461_s19, %s598_s4 }
 0x114   :  { %p467_p1 = pnand %p465_p0, %p462_p13 }
 0x116   :  { %470 = shalt.err (!%p467_p1)
}
 0x117   :  { %241 = dma.vmem_to_hbm [thread:$0]  %s236_s17, 256, %s598_s4, [#allocation4], %s476_s25, %s476_s25, %s477_s26  }
 0x118   :  { %473 = dma.done.wait [#allocation4], 256  }
 0x119   :  { %474 = vsyncadd [#allocation4], 4294967040 }
 0x11a   :  { %245 = vsyncpa [#allocation3], 1 }
 0x11b   :  { %246 = vsyncpa [#allocation4], 1 }

</bundles_post_ra>
